<compile_context>
chip_gen: v7x
topology: tpu7x:2x2x1
jax: 0.10.0
libtpu: 0.0.40
codegen_flags: <defaults>
</compile_context>

<pallas_src>
import jax
import jax.numpy as jnp
from jax.experimental import pallas as pl
from jax.experimental.pallas import tpu as pltpu


def svd_stack_kernel(x_ref, w1_ref, b1_ref, w2_ref, b2_ref, ws_ref, y_ref):
    x = x_ref[...]

    # Main path: affine1 -> relu -> affine2
    h = jnp.dot(x, w1_ref[...], preferred_element_type=jnp.float32)
    h = jnp.maximum(h + b1_ref[...], 0.0)
    out = jnp.dot(h, w2_ref[...], preferred_element_type=jnp.float32)
    out = out + b2_ref[...]

    # Skip path: single matmul against the pre-fused low-rank weight Ws1 @ Ws2
    skip = jnp.dot(x, ws_ref[...], preferred_element_type=jnp.float32)

    y_ref[...] = (out + skip).astype(y_ref.dtype)


def _round_up(n, m):
    return ((n + m - 1) // m) * m


def svd_stack_forward(x, w1, b1, w2, b2, ws1, ws2, *, tile_b=512):
    """x: (B, input_dim); weights in (in, out) layout; biases (1, out)."""
    B, input_dim = x.shape
    output_dim = w2.shape[1]

    # Pre-fuse the low-rank skip path: (x @ Ws1) @ Ws2 == x @ (Ws1 @ Ws2).
    # Halves the skip-path MXU work inside the kernel (K=rank is tiny and
    # would be padded to full MXU K-width anyway).
    ws = jnp.dot(ws1, ws2, preferred_element_type=jnp.float32).astype(w2.dtype)

    # Lane-dense output: pad the output feature dim to a multiple of 128 so
    # stores are full-width (no masked vst.msk).  Sliced off on return.
    out_pad = _round_up(output_dim, 128)
    if out_pad != output_dim:
        pad = out_pad - output_dim
        w2 = jnp.pad(w2, ((0, 0), (0, pad)))
        b2 = jnp.pad(b2, ((0, 0), (0, pad)))
        ws = jnp.pad(ws, ((0, 0), (0, pad)))

    # Batch tiling: tile must be a multiple of 8 (f32 sublanes).  Pad the
    # batch up to a multiple of the tile; padded rows are sliced off.
    tile_b = min(tile_b, _round_up(B, 8))
    tile_b = _round_up(tile_b, 8)
    b_pad = _round_up(B, tile_b)
    if b_pad != B:
        x = jnp.pad(x, ((0, b_pad - B), (0, 0)))

    grid = (b_pad // tile_b,)
    const = lambda i: (0, 0)  # weights/biases: DMA'd once, stay resident

    y_padded = pl.pallas_call(
        svd_stack_kernel,
        out_shape=jax.ShapeDtypeStruct((b_pad, out_pad), x.dtype),
        grid=grid,
        in_specs=[
            pl.BlockSpec((tile_b, input_dim), lambda i: (i, 0)),  # x tiles
            pl.BlockSpec(w1.shape, const),
            pl.BlockSpec(b1.shape, const),
            pl.BlockSpec(w2.shape, const),
            pl.BlockSpec(b2.shape, const),
            pl.BlockSpec(ws.shape, const),
        ],
        out_specs=pl.BlockSpec((tile_b, out_pad), lambda i: (i, 0)),
        compiler_params=pltpu.CompilerParams(
            dimension_semantics=("parallel",),
        ),
    )(x, w1, b1, w2, b2, ws)

    return y_padded[:B, :output_dim]


def init_params(key, input_dim, hidden_dim, output_dim, hidden_affine_dim):
    """Deterministic init; shapes follow nn.Linear (stored transposed)."""
    ks = jax.random.split(key, 6)

    def u(k, shape, fan_in):
        bound = 1.0 / jnp.sqrt(fan_in)
        return jax.random.uniform(k, shape, jnp.float32, -bound, bound)

    w1 = u(ks[0], (input_dim, hidden_dim), input_dim)
    b1 = u(ks[1], (1, hidden_dim), input_dim)
    w2 = u(ks[2], (hidden_dim, output_dim), hidden_dim)
    b2 = u(ks[3], (1, output_dim), hidden_dim)
    ws1 = u(ks[4], (input_dim, hidden_affine_dim), input_dim)
    ws2 = u(ks[5], (hidden_affine_dim, output_dim), hidden_affine_dim)
    return w1, b1, w2, b2, ws1, ws2


def reference_forward(x, w1, b1, w2, b2, ws1, ws2):
    out = jnp.maximum(x @ w1 + b1, 0.0) @ w2 + b2
    skip = (x @ ws1) @ ws2
    return out + skip


if __name__ == "__main__":
    input_dim = 32
    hidden_dim = 64
    output_dim = 16
    hidden_affine_dim = 8

    key = jax.random.PRNGKey(0)
    kx, kx2, kp = jax.random.split(key, 3)
    params = init_params(kp, input_dim, hidden_dim, output_dim,
                         hidden_affine_dim)

    # Case 1: small batch, single grid step.
    x = jax.random.normal(kx, (8, input_dim), jnp.float32)
    y = jax.block_until_ready(svd_stack_forward(x, *params))
    y_ref = reference_forward(x, *params)
    assert y.shape == (8, output_dim)
    assert jnp.allclose(y, y_ref, atol=1e-5, rtol=1e-5)

    # Case 2: batch not a tile multiple -> exercises padding + multi-step grid.
    x2 = jax.random.normal(kx2, (20, input_dim), jnp.float32)
    y2 = jax.block_until_ready(svd_stack_forward(x2, *params, tile_b=8))
    y2_ref = reference_forward(x2, *params)
    assert y2.shape == (20, output_dim)
    assert jnp.allclose(y2, y2_ref, atol=1e-5, rtol=1e-5)

    print("KERNEL_OK")
</pallas_src>

<mosaic_0001>
module attributes {stable_mosaic.version = 11 : i64} {
  func.func @svd_stack_kernel(%arg0: i32, %arg1: memref<8x32xf32, #tpu.memory_space<vmem>>, %arg2: memref<32x64xf32, #tpu.memory_space<vmem>>, %arg3: memref<1x64xf32, #tpu.memory_space<vmem>>, %arg4: memref<64x128xf32, #tpu.memory_space<vmem>>, %arg5: memref<1x128xf32, #tpu.memory_space<vmem>>, %arg6: memref<32x128xf32, #tpu.memory_space<vmem>>, %arg7: memref<8x128xf32, #tpu.memory_space<vmem>>) attributes {dimension_semantics = [#tpu.dimension_semantics<parallel>], iteration_bounds = array<i64: 1>, scalar_prefetch = 0 : i64, scratch_operands = 0 : i64, tpu.core_type = #tpu.core_type<tc>, window_params = [{transform_indices = @transform_0, window_bounds = array<i64: 8, 32>}, {pipeline_mode = #tpu.pipeline_mode<synchronous>, transform_indices = @transform_1, window_bounds = array<i64: 32, 64>}, {pipeline_mode = #tpu.pipeline_mode<synchronous>, transform_indices = @transform_2, window_bounds = array<i64: 1, 64>}, {pipeline_mode = #tpu.pipeline_mode<synchronous>, transform_indices = @transform_3, window_bounds = array<i64: 64, 128>}, {pipeline_mode = #tpu.pipeline_mode<synchronous>, transform_indices = @transform_4, window_bounds = array<i64: 1, 128>}, {pipeline_mode = #tpu.pipeline_mode<synchronous>, transform_indices = @transform_5, window_bounds = array<i64: 32, 128>}, {transform_indices = @transform_6, window_bounds = array<i64: 8, 128>}]} {
    %c0 = arith.constant 0 : index
    %c0_0 = arith.constant 0 : index
    %0 = vector.load %arg1[%c0, %c0_0] : memref<8x32xf32, #tpu.memory_space<vmem>>, vector<8x32xf32>
    %c0_1 = arith.constant 0 : index
    %c0_2 = arith.constant 0 : index
    %1 = vector.load %arg2[%c0_1, %c0_2] : memref<32x64xf32, #tpu.memory_space<vmem>>, vector<32x64xf32>
    %cst = arith.constant dense<0.000000e+00> : vector<8x64xf32>
    %2 = tpu.matmul %0, %1, %cst {dimension_numbers = #tpu.dot_dimension_numbers<[1], [0], [0], [1], [0, 0, 1, 1], [], []>} : vector<8x32xf32>, vector<32x64xf32>, vector<8x64xf32> -> vector<8x64xf32>
    %c0_3 = arith.constant 0 : index
    %c0_4 = arith.constant 0 : index
    %3 = vector.load %arg3[%c0_3, %c0_4] : memref<1x64xf32, #tpu.memory_space<vmem>>, vector<1x64xf32>
    %4 = vector.broadcast %3 : vector<1x64xf32> to vector<8x64xf32>
    %5 = arith.addf %2, %4 : vector<8x64xf32>
    %cst_5 = arith.constant 0.000000e+00 : f32
    %6 = vector.broadcast %cst_5 : f32 to vector<8x64xf32>
    %7 = arith.maximumf %5, %6 : vector<8x64xf32>
    %c0_6 = arith.constant 0 : index
    %c0_7 = arith.constant 0 : index
    %8 = vector.load %arg4[%c0_6, %c0_7] : memref<64x128xf32, #tpu.memory_space<vmem>>, vector<64x128xf32>
    %cst_8 = arith.constant dense<0.000000e+00> : vector<8x128xf32>
    %9 = tpu.matmul %7, %8, %cst_8 {dimension_numbers = #tpu.dot_dimension_numbers<[1], [0], [0], [1], [0, 0, 1, 1], [], []>} : vector<8x64xf32>, vector<64x128xf32>, vector<8x128xf32> -> vector<8x128xf32>
    %c0_9 = arith.constant 0 : index
    %c0_10 = arith.constant 0 : index
    %10 = vector.load %arg5[%c0_9, %c0_10] : memref<1x128xf32, #tpu.memory_space<vmem>>, vector<1x128xf32>
    %11 = vector.broadcast %10 : vector<1x128xf32> to vector<8x128xf32>
    %12 = arith.addf %9, %11 : vector<8x128xf32>
    %c0_11 = arith.constant 0 : index
    %c0_12 = arith.constant 0 : index
    %13 = vector.load %arg6[%c0_11, %c0_12] : memref<32x128xf32, #tpu.memory_space<vmem>>, vector<32x128xf32>
    %cst_13 = arith.constant dense<0.000000e+00> : vector<8x128xf32>
    %14 = tpu.matmul %0, %13, %cst_13 {dimension_numbers = #tpu.dot_dimension_numbers<[1], [0], [0], [1], [0, 0, 1, 1], [], []>} : vector<8x32xf32>, vector<32x128xf32>, vector<8x128xf32> -> vector<8x128xf32>
    %15 = arith.addf %12, %14 : vector<8x128xf32>
    %c0_14 = arith.constant 0 : index
    %c0_15 = arith.constant 0 : index
    %16 = vector.load %arg7[%c0_14, %c0_15] : memref<8x128xf32, #tpu.memory_space<vmem>>, vector<8x128xf32>
    tpu.vector_store %arg7[%c0_14, %c0_15], %15 {strides = array<i32>} : memref<8x128xf32, #tpu.memory_space<vmem>>, vector<8x128xf32>,
    return
  }
  func.func @transform_0(%arg0: i32) -> (i32, i32) {
    %c0_i32 = arith.constant 0 : i32
    %c0_i32_0 = arith.constant 0 : i32
    return %arg0, %c0_i32 : i32, i32
  }
  func.func @transform_1(%arg0: i32) -> (i32, i32) {
    %c0_i32 = arith.constant 0 : i32
    %c0_i32_0 = arith.constant 0 : i32
    %c0_i32_1 = arith.constant 0 : i32
    return %c0_i32, %c0_i32_0 : i32, i32
  }
  func.func @transform_2(%arg0: i32) -> (i32, i32) {
    %c0_i32 = arith.constant 0 : i32
    %c0_i32_0 = arith.constant 0 : i32
    %c0_i32_1 = arith.constant 0 : i32
    return %c0_i32, %c0_i32_0 : i32, i32
  }
  func.func @transform_3(%arg0: i32) -> (i32, i32) {
    %c0_i32 = arith.constant 0 : i32
    %c0_i32_0 = arith.constant 0 : i32
    %c0_i32_1 = arith.constant 0 : i32
    return %c0_i32, %c0_i32_0 : i32, i32
  }
  func.func @transform_4(%arg0: i32) -> (i32, i32) {
    %c0_i32 = arith.constant 0 : i32
    %c0_i32_0 = arith.constant 0 : i32
    %c0_i32_1 = arith.constant 0 : i32
    return %c0_i32, %c0_i32_0 : i32, i32
  }
  func.func @transform_5(%arg0: i32) -> (i32, i32) {
    %c0_i32 = arith.constant 0 : i32
    %c0_i32_0 = arith.constant 0 : i32
    %c0_i32_1 = arith.constant 0 : i32
    return %c0_i32, %c0_i32_0 : i32, i32
  }
  func.func @transform_6(%arg0: i32) -> (i32, i32) {
    %c0_i32 = arith.constant 0 : i32
    %c0_i32_0 = arith.constant 0 : i32
    return %arg0, %c0_i32 : i32, i32
  }
}

</mosaic_0001>

<bundles_post_ra>
// kernel: tpu_custom_call.1
= control target key start
LH: loop header
LB: loop body
LE: loop exit
PB: predicated region body
PF: predicated region fallthrough
CT: control target
= control target key end

     0   :  { %11 = vsyncpa [#allocation3], 0  ;;  %s690_s0 = inlined_call_operand.hbm [shape: f32[8,32], index: 0, kind: input, shape index: {}]   ;;  %s691_s1 = inlined_call_operand.hbm [shape: f32[32,64], index: 1, kind: input, shape index: {}]   ;;  %s692_s2 = inlined_call_operand.vmem [shape: f32[1,64], index: 2, kind: input, shape index: {}]   ;;  %s693_s3 = inlined_call_operand.hbm [shape: f32[64,128], index: 3, kind: input, shape index: {}]   ;;  %s694_s4 = inlined_call_operand.vmem [shape: f32[1,128], index: 4, kind: input, shape index: {}]   ;;  %s695_s5 = inlined_call_operand.hbm [shape: f32[32,128], index: 5, kind: input, shape index: {}]   ;;  %s696_s6 = inlined_call_operand.hbm [shape: f32[8,128], index: 6, kind: output, shape index: {}]  }
   0x1   :  { %12 = vsyncpa [#allocation6], 0 }
   0x2   :  { %13 = vsyncpa [#allocation9], 0 }
   0x3   :  { %14 = vsyncpa [#allocation4], 0  ;;  %s565_s21 = smov [#allocation5]   ;;  %s447_s25 = scalar_lea.hbm %s691_s1, 512 }
   0x4   :  { %s30_s22 = sshll.u32 %s565_s21, 4  ;;  %p448_p0 = scmp.ne.s32.totalorder %s691_s1, %s447_s25  ;;  %s31_s22 = int_to_ptr.vmem [resolvable:$true] %s30_s22 }
   0x5   :  { %p451_p1 = scmp.lt.u32.totalorder %s447_s25, %s691_s1 }
   0x7   :  { %p453_p2 = pnand %p451_p1, %p448_p0 }
   0x9   :  { %456 = shalt.err (!%p453_p2)
}
   0xa   :  { %s457_s30 = scalar_lea.vmem %s31_s22, 512  ;;  %p462_p4 = scmp.lt.s32.totalorder %s31_s22, %s31_s22 }
   0xb   :  { %p458_p3 = scmp.ne.s32.totalorder %s31_s22, %s457_s30  ;;  %p463_p5 = scmp.lt.s32.totalorder %s457_s30, %s457_s30 }
   0xd   :  { %p464_p6 = por %p463_p5, %p462_p4 }
   0xf   :  { %p465_p7 = pnand %p464_p6, %p458_p3 }
  0x11   :  { %468 = shalt.err (!%p465_p7)
}
  0x12   :  { %s566_s7 = smov 128   ;;  %s567_s8 = smov 8  }
  0x13   :  { %36 = dma.hbm_to_vmem [thread:$0]  %s691_s1, 512, %s31_s22, [#allocation6], %s566_s7, %s566_s7, %s567_s8  }
  0x14   :  { %s568_s11 = smov [#allocation2]   ;;  %s569_s13 = smov [#allocation7]  }
  0x15   :  { %s21_s12 = sshll.u32 %s568_s11, 4  ;;  %s44_s14 = sshll.u32 %s569_s13, 4  ;;  %s22_s12 = int_to_ptr.vmem [resolvable:$true] %s21_s12  ;;  %s45_s14 = int_to_ptr.vmem [resolvable:$true] %s44_s14 }
  0x16   :  { %s469_s17 = scalar_lea.hbm %s690_s0, 128 }
  0x17   :  { %p470_p8 = scmp.ne.s32.totalorder %s690_s0, %s469_s17  ;;  %p473_p9 = scmp.lt.u32.totalorder %s469_s17, %s690_s0 }
  0x19   :  { %p475_p10 = pnand %p473_p9, %p470_p8 }
  0x1b   :  { %478 = shalt.err (!%p475_p10)
}
  0x1c   :  { %s479_s1 = scalar_lea.vmem %s22_s12, 128  ;;  %p484_p12 = scmp.lt.s32.totalorder %s22_s12, %s22_s12 }
  0x1d   :  { %p480_p11 = scmp.ne.s32.totalorder %s22_s12, %s479_s1  ;;  %p485_p13 = scmp.lt.s32.totalorder %s479_s1, %s479_s1 }
  0x1f   :  { %p486_p0 = por %p485_p13, %p484_p12 }
  0x21   :  { %p487_p1 = pnand %p486_p0, %p480_p11 }
  0x23   :  { %490 = shalt.err (!%p487_p1)
}
  0x24   :  { %24 = dma.hbm_to_vmem [thread:$0]  %s690_s0, 128, %s22_s12, [#allocation3]  }
  0x25   :  { %s491_s26 = scalar_lea.hbm %s693_s3, 1024 }
  0x26   :  { %p492_p2 = scmp.ne.s32.totalorder %s693_s3, %s491_s26  ;;  %p495_p3 = scmp.lt.u32.totalorder %s491_s26, %s693_s3 }
  0x28   :  { %p497_p4 = pnand %p495_p3, %p492_p2 }
  0x2a   :  { %500 = shalt.err (!%p497_p4)
}
  0x2b   :  { %s501_s9 = scalar_lea.vmem %s45_s14, 1024  ;;  %p506_p6 = scmp.lt.s32.totalorder %s45_s14, %s45_s14 }
  0x2c   :  { %p502_p5 = scmp.ne.s32.totalorder %s45_s14, %s501_s9  ;;  %p507_p7 = scmp.lt.s32.totalorder %s501_s9, %s501_s9 }
  0x2e   :  { %p508_p8 = por %p507_p7, %p506_p6 }
  0x30   :  { %p509_p9 = pnand %p508_p8, %p502_p5 }
  0x32   :  { %512 = shalt.err (!%p509_p9)
}
  0x33   :  { %50 = dma.hbm_to_vmem [thread:$0]  %s693_s3, 1024, %s45_s14, [#allocation6], %s566_s7, %s566_s7, %s567_s8  }
  0x34   :  { %s570_s11 = smov [#allocation8]   ;;  %s513_s16 = scalar_lea.hbm %s695_s5, 512 }
  0x35   :  { %s58_s12 = sshll.u32 %s570_s11, 4  ;;  %p514_p10 = scmp.ne.s32.totalorder %s695_s5, %s513_s16  ;;  %s59_s12 = int_to_ptr.vmem [resolvable:$true] %s58_s12 }
  0x36   :  { %p517_p11 = scmp.lt.u32.totalorder %s513_s16, %s695_s5 }
  0x38   :  { %p519_p12 = pnand %p517_p11, %p514_p10 }
  0x3a   :  { %522 = shalt.err (!%p519_p12)
}
  0x3b   :  { %s523_s21 = scalar_lea.vmem %s59_s12, 512  ;;  %p528_p0 = scmp.lt.s32.totalorder %s59_s12, %s59_s12 }
  0x3c   :  { %p524_p13 = scmp.ne.s32.totalorder %s59_s12, %s523_s21  ;;  %p529_p1 = scmp.lt.s32.totalorder %s523_s21, %s523_s21 }
  0x3e   :  { %p530_p2 = por %p529_p1, %p528_p0 }
  0x40   :  { %p531_p3 = pnand %p530_p2, %p524_p13 }
  0x42   :  { %534 = shalt.err (!%p531_p3)
}
  0x43   :  { %64 = dma.hbm_to_vmem [thread:$0]  %s695_s5, 512, %s59_s12, [#allocation9], %s566_s7, %s566_s7, %s567_s8  }
  0x44   :  { %557 = dma.done.wait [#allocation3], 128  }
  0x45   :  { %558 = vsyncadd [#allocation3], 4294967168 }
  0x46   :  { %559 = dma.done.wait [#allocation6], 1536  }
  0x47   :  { %560 = vsyncadd [#allocation6], 4294965760 }
  0x48   :  { %561 = dma.done.wait [#allocation9], 512  }
  0x49   :  { %562 = vsyncadd [#allocation9], 4294966784  ;;  %v571_v0 = vmov 0.0|0.0   ;;  %vm572_vm0 = vmmov 0   ;;  %v573_v1 = vmov 0.0   ;;  %v78_v2 = vld [vmem:[#allocation5] sm:$0xff] }
  0x4a   :  { %411 = vmatprep.subr.bf16.mxu0 %v571_v0  ;;  %378 = vmatprep.mubr.msk.f32.mxu0 %vm572_vm0, %v573_v1  ;;  %v79_v3 = vld [vmem:[#allocation5 + $0x8] sm:$0xff]  ;;  %v80_v4 = vld [vmem:[#allocation5 + $0x10] sm:$0xff]  ;;  %v81_v6 = vld [vmem:[#allocation5 + $0x18] sm:$0xff]  ;;  %vm89_vm1 = vcmask 261120   ;;  %vm179_vm2 = vcmask 523264   ;;  %s574_s22 = smov [#allocation10]  }
  0x4b   :  { %417 = vmatprep.subr.bf16.mxu1 %v571_v0  ;;  %397 = vmatprep.mubr.msk.f32.mxu1 %vm572_vm0, %v573_v1  ;;  %v412_v5 = vpack.c.bf16 %v79_v3, %v78_v2  ;;  %v164_v7 = vld [vmem:[#allocation7] sm:$0xff]  ;;  %v165_v8 = vld [vmem:[#allocation7 + $0x8] sm:$0xff]  ;;  %v166_v9 = vld [vmem:[#allocation7 + $0x10] sm:$0xff]  ;;  %v415_v11 = vpack.c.bf16 %v81_v6, %v80_v4  ;;  %s335_s23 = sshll.u32 %s574_s22, 4  ;;  %s336_s23 = int_to_ptr.vmem [resolvable:$true] %s335_s23 }
  0x4c   :  { %v167_v10 = vld [vmem:[#allocation7 + $0x18] sm:$0xff]  ;;  %v418_v12 = vpack.c.bf16 %v165_v8, %v164_v7  ;;  %v253_v13 = vld [vmem:[#allocation8] sm:$0xff]  ;;  %v254_v14 = vld [vmem:[#allocation8 + $0x8] sm:$0xff]  ;;  %p540_p5 = scmp.lt.s32.totalorder %s336_s23, %s336_s23 }
  0x4d   :  { %413 = vmatpush3.bf16.msra.mxu0 %v412_v5  ;;  %v421_v15 = vpack.c.bf16 %v167_v10, %v166_v9  ;;  %v168_v16 = vld [vmem:[#allocation7 + $0x20] sm:$0xff]  ;;  %v169_v17 = vld [vmem:[#allocation7 + $0x28] sm:$0xff]  ;;  %v77_v18 = vld [vmem:[#allocation2] sm:$0xff]  ;;  %v430_v19 = vpack.c.bf16 %v254_v14, %v253_v13 }
  0x4e   :  { %414 = vmatprep.subr.bf16.mxu0 %v571_v0  ;;  %419 = vmatpush3.bf16.msra.mxu1 %v418_v12  ;;  %v424_v20 = vpack.c.bf16 %v169_v17, %v168_v16  ;;  %v170_v21 = vld [vmem:[#allocation7 + $0x30] sm:$0xff]  ;;  %v171_v22 = vld [vmem:[#allocation7 + $0x38] sm:$0xff] }
  0x4f   :  { %420 = vmatprep.subr.bf16.mxu1 %v571_v0  ;;  %v427_v23 = vpack.c.bf16 %v171_v22, %v170_v21  ;;  %v255_v24 = vld [vmem:[#allocation8 + $0x10] sm:$0xff]  ;;  %v256_v25 = vld [vmem:[#allocation8 + $0x18] sm:$0xff] }
  0x50   :  { %v433_v26 = vpack.c.bf16 %v256_v25, %v255_v24  ;;  %v346_v27 = vld [vmem:[%s692_s2] ss:$0 sm:$0xff]  ;;  %s535_s2 = scalar_lea.vmem %s336_s23, 128 }
  0x51   :  { %416 = vmatpush3.bf16.msra.mxu0 %v415_v11  ;;  %v348_v34 = vld [vmem:[%s694_s4] ss:$0 sm:$0xff]  ;;  %p536_p4 = scmp.ne.s32.totalorder %s336_s23, %s535_s2  ;;  %p541_p6 = scmp.lt.s32.totalorder %s535_s2, %s535_s2 }
  0x52   :  { %429 = vmatprep.subr.bf16.mxu0 %v571_v0  ;;  %422 = vmatpush3.bf16.msra.mxu1 %v421_v15 }
  0x53   :  { %423 = vmatprep.subr.bf16.mxu1 %v571_v0  ;;  %p542_p7 = por %p541_p6, %p540_p5 }
  0x54   :  { %379 = vmatmul.mubr.msk.f32.vlgmr.msra.gmra.mrb[0].mxu0 %vm89_vm1, %v77_v18 }
  0x55   :  { %431 = vmatpush3.bf16.msra.mxu0 %v430_v19  ;;  %408 = vmatprep.mubr.msk.f32.mxu0 %vm572_vm0, %v573_v1  ;;  %p543_p8 = pnand %p542_p7, %p536_p4 }
  0x56   :  { %432 = vmatprep.subr.bf16.mxu0 %v571_v0  ;;  %425 = vmatpush3.bf16.msra.mxu1 %v424_v20 }
  0x57   :  { %426 = vmatprep.subr.bf16.mxu1 %v571_v0 }
  0x59   :  { %434 = vmatpush3.bf16.msra.mxu0 %v433_v26 }
  0x5a   :  { %428 = vmatpush3.bf16.msra.mxu1 %v427_v23 }
  0x5c   :  { %409 = vmatmul.mubr.msk.f32.vlgmr.msra.gmra.mrb[2].mxu0 %vm89_vm1, %v77_v18 }
 0x127   :  { %v159_v28 = vpop.f32.mrb[0].mxu0 }
 0x128   :  { %v160_v29 = vadd.f32 %v346_v27, %v159_v28  ;;  %v380_v30 = vpop.f32.mrb[1].mxu0 }
 0x12a   :  { %v163_v31 = vmax.f32 %v160_v29, 0.0 }
 0x12c   :  { %398 = vmatmul.mubr.msk.f32.vlgmr.msra.gmra.mrb[0].mxu1 %vm179_vm2, %v163_v31 }
 0x12f   :  { %v323_v32 = vpop.f32.mrb[2].mxu0 }
 0x130   :  { %v410_v33 = vpop.f32.mrb[3].mxu0 }
 0x1ff   :  { %v249_v35 = vpop.f32.mrb[0].mxu1 }
 0x200   :  { %v250_v36 = vadd.f32 %v348_v34, %v249_v35  ;;  %v399_v37 = vpop.f32.mrb[1].mxu1 }
 0x202   :  { %v327_v38 = vadd.f32 %v323_v32, %v250_v36 }
 0x204   :  { %328 = vst [vmem:[#allocation10] sm:$0xff] %v327_v38 }
 0x205   :  { %546 = shalt.err (!%p543_p8)
}
 0x206   :  { %s547_s26 = scalar_lea.hbm %s696_s6, 128 }
 0x207   :  { %p548_p9 = scmp.ne.s32.totalorder %s696_s6, %s547_s26  ;;  %p551_p10 = scmp.lt.u32.totalorder %s547_s26, %s696_s6 }
 0x209   :  { %p553_p11 = pnand %p551_p10, %p548_p9 }
 0x20b   :  { %556 = shalt.err (!%p553_p11)
}
 0x20c   :  { %338 = dma.vmem_to_hbm [thread:$0]  %s336_s23, 128, %s696_s6, [#allocation4]  }
 0x20d   :  { %563 = dma.done.wait [#allocation4], 128  }
 0x20e   :  { %564 = vsyncadd [#allocation4], 4294967168 }
 0x20f   :  { %342 = vsyncpa [#allocation3], 1 }
 0x210   :  { %343 = vsyncpa [#allocation6], 1 }
 0x211   :  { %344 = vsyncpa [#allocation9], 1 }
 0x212   :  { %345 = vsyncpa [#allocation4], 1 }

</bundles_post_ra>
